<compile_context>
chip_gen: v5e
topology: v5e:2x2
jax: 0.10.0
libtpu: 0.0.40
codegen_flags: <defaults>
</compile_context>

<pallas_src>
from functools import partial

import jax
import jax.numpy as jnp
from jax.experimental import pallas as pl
from jax.experimental.pallas import tpu as pltpu


# -----------------------------------------------------------------------------
# Kernel: per (n, channel-group) block, in a lane-dense (Cb, H*W) layout:
#   * fused numerically-stable softmax over the 9 tap logits,
#   * reflect-padded depthwise 3x3 weighted sum built from pltpu.roll rotations
#     along the flattened lane axis + boundary selects (no halo scratch,
#     no per-channel loop),
#   * residual (x - out).
# x is the only spatial input (read from HBM exactly once); out/res are the
# only spatial outputs.
# -----------------------------------------------------------------------------
def dynconv_kernel(tap_ref, x_ref, out_ref, res_ref, *, h, w):
    cb = x_ref.shape[1]
    hw = h * w

    # --- softmax over the 9 taps per channel (tiny; stays fused) --------------
    logits = tap_ref[0].astype(jnp.float32)                     # (cb, 9)
    m = jnp.max(logits, axis=-1, keepdims=True)
    e = jnp.exp(logits - m)
    taps = e / jnp.sum(e, axis=-1, keepdims=True)               # (cb, 9)

    x = x_ref[0].astype(jnp.float32)                            # (cb, hw)

    # --- reflect-boundary masks on the flattened lane axis --------------------
    lane = jax.lax.broadcasted_iota(jnp.int32, (cb, hw), 1)
    col = lane % w
    row0 = lane < w                                             # i == 0
    rowN = lane >= (h - 1) * w                                  # i == H-1
    col0 = col == 0                                             # j == 0
    colN = col == w - 1                                         # j == W-1

    def tap(k):                                                 # (cb, 1) weight
        return taps[:, k:k + 1]

    # pltpu.roll follows jnp.roll semantics: result[..., p] = v[..., (p - s) % hw]
    def row_terms(v, k0, acc):
        # v is the row-resolved slab for kernel row (k0 // 3); add its 3 column taps.
        cm = pltpu.roll(v, 1, axis=1)                           # reads column j-1
        cp = pltpu.roll(v, hw - 1, axis=1)                      # reads column j+1
        left = jnp.where(col0, cp, cm)                          # reflect j=-1 -> 1
        right = jnp.where(colN, cm, cp)                         # reflect j=W  -> W-2
        t = left * tap(k0) + v * tap(k0 + 1) + right * tap(k0 + 2)
        return t if acc is None else acc + t

    rm = pltpu.roll(x, w, axis=1)                               # reads row i-1
    rp = pltpu.roll(x, hw - w, axis=1)                          # reads row i+1
    up = jnp.where(row0, rp, rm)                                # reflect i=-1 -> 1
    down = jnp.where(rowN, rm, rp)                              # reflect i=H  -> H-2

    acc = row_terms(up, 0, None)                                # taps 0,1,2
    acc = row_terms(x, 3, acc)                                  # taps 3,4,5
    acc = row_terms(down, 6, acc)                               # taps 6,7,8

    out_ref[0] = acc.astype(out_ref.dtype)
    res_ref[0] = (x - acc).astype(res_ref.dtype)


# -----------------------------------------------------------------------------
# Channel-block sizing against REAL (tile-padded) VMEM bytes: last dim padded to
# a multiple of 128 lanes.  Cb must divide C and be a multiple of 8 (or == C)
# to satisfy the (8,128) block constraint.  target_bytes is the single-copy
# x+out+res tile footprint; double buffering and in-kernel temporaries stay
# well inside the 32 MiB limit set below (safe on v5e/v6e/v7x).
# -----------------------------------------------------------------------------
def _pick_channel_block(c, hw, itemsize, target_bytes=4 << 20):
    hw_pad = -(-hw // 128) * 128
    per_chan = 3 * hw_pad * itemsize            # x + out + res, one buffer copy
    max_cb = max(1, target_bytes // per_chan)
    if c <= max_cb:
        return c
    best = None
    for cand in range(8, c, 8):
        if c % cand == 0 and cand <= max_cb:
            best = cand
    return best if best is not None else c      # whole-C fallback is always legal


# -----------------------------------------------------------------------------
# Wrapper: XLA glue (pool, 1x1-conv matmul, BN fold, free reshapes) + one
# Pallas call for the spatial work.
# -----------------------------------------------------------------------------
def dynamic_conv(x, conv_w, bn_gamma, bn_beta, bn_mean, bn_var, eps=1e-5):
    N, C, H, W = x.shape
    K = 3
    KK = K * K
    HW = H * W

    # --- tiny filter path in XLA: pool -> 1x1 conv (matmul) -> folded BN ------
    conv_w = conv_w.reshape(C * KK, C).astype(jnp.float32)       # (9C, C)
    pooled = jnp.mean(x, axis=(2, 3)).astype(jnp.float32)        # (N, C)
    scale = (bn_gamma / jnp.sqrt(bn_var + eps)).astype(jnp.float32)
    shift = (bn_beta - bn_mean * scale).astype(jnp.float32)
    logits = (pooled @ conv_w.T) * scale + shift                 # (N, 9C)
    tap_logits = logits.reshape(N, C, KK)                        # [n, c, k] = chan c*9+k

    # --- lane-dense spatial layout (free reshape for contiguous NCHW) ---------
    x_flat = x.reshape(N, C, HW)

    Cb = _pick_channel_block(C, HW, x.dtype.itemsize)
    grid = (N, C // Cb)                                          # both axes parallel

    out_flat, res_flat = pl.pallas_call(
        partial(dynconv_kernel, h=H, w=W),
        grid=grid,
        out_shape=(
            jax.ShapeDtypeStruct((N, C, HW), x.dtype),
            jax.ShapeDtypeStruct((N, C, HW), x.dtype),
        ),
        in_specs=[
            pl.BlockSpec((1, Cb, KK), lambda n, g: (n, g, 0)),   # tap logits
            pl.BlockSpec((1, Cb, HW), lambda n, g: (n, g, 0)),   # x (only spatial read)
        ],
        out_specs=(
            pl.BlockSpec((1, Cb, HW), lambda n, g: (n, g, 0)),
            pl.BlockSpec((1, Cb, HW), lambda n, g: (n, g, 0)),
        ),
        compiler_params=pltpu.CompilerParams(
            dimension_semantics=("parallel", "parallel"),
            vmem_limit_bytes=32 * 1024 * 1024,
        ),
    )(tap_logits, x_flat)

    return out_flat.reshape(N, C, H, W), res_flat.reshape(N, C, H, W)


# -----------------------------------------------------------------------------
# Pure-JAX reference (mirrors the PyTorch forward, eval-mode BN).
# -----------------------------------------------------------------------------
def reference(x, conv_w, bn_gamma, bn_beta, bn_mean, bn_var, eps=1e-5):
    N, C, H, W = x.shape
    KK = 9
    pooled = jnp.mean(x, axis=(2, 3))                      # (N, C)
    f = pooled @ conv_w.T                                  # (N, C*9)
    scale = bn_gamma / jnp.sqrt(bn_var + eps)
    f = (f - bn_mean) * scale + bn_beta
    f = jax.nn.softmax(f.reshape(N, C, KK), axis=-1)       # (N, C, 9)
    xp = jnp.pad(x, ((0, 0), (0, 0), (1, 1), (1, 1)), mode="reflect")
    patches = jnp.stack(
        [xp[:, :, ki:ki + H, kj:kj + W] for ki in range(3) for kj in range(3)],
        axis=2,
    )                                                      # (N, C, 9, H, W)
    out = jnp.sum(patches * f[:, :, :, None, None], axis=2)
    return out, x - out


if __name__ == "__main__":
    N, C, H, W = 2, 4, 16, 16
    KK = 9

    key = jax.random.PRNGKey(0)
    kx, kw, kg, kb, km, kv = jax.random.split(key, 6)

    x = jax.random.normal(kx, (N, C, H, W), jnp.float32)

    # Conv2d(C, C*9, kernel_size=1, bias=False), kaiming_normal fan_out/relu:
    fan_out = C * KK
    conv_w = jax.random.normal(kw, (C * KK, C), jnp.float32) * jnp.sqrt(2.0 / fan_out)

    # BatchNorm2d(C*9) parameters / running stats (deterministic, nontrivial).
    bn_gamma = 0.5 + jax.random.uniform(kg, (C * KK,), jnp.float32)
    bn_beta = 0.1 * jax.random.normal(kb, (C * KK,), jnp.float32)
    bn_mean = 0.1 * jax.random.normal(km, (C * KK,), jnp.float32)
    bn_var = 0.5 + jax.random.uniform(kv, (C * KK,), jnp.float32)

    out, res = jax.block_until_ready(
        dynamic_conv(x, conv_w, bn_gamma, bn_beta, bn_mean, bn_var)
    )

    ref_out, ref_res = reference(x, conv_w, bn_gamma, bn_beta, bn_mean, bn_var)
    assert out.shape == (N, C, H, W) and res.shape == (N, C, H, W)
    assert jnp.allclose(out, ref_out, atol=2e-3, rtol=2e-3), "out mismatch"
    assert jnp.allclose(res, ref_res, atol=2e-3, rtol=2e-3), "residual mismatch"

    print("KERNEL_OK")
</pallas_src>

<mosaic_0001>
module attributes {stable_mosaic.version = 11 : i64} {
  func.func @dynconv_kernel(%arg0: i32, %arg1: i32, %arg2: memref<1x4x9xf32, #tpu.memory_space<vmem>>, %arg3: memref<1x4x256xf32, #tpu.memory_space<vmem>>, %arg4: memref<1x4x256xf32, #tpu.memory_space<vmem>>, %arg5: memref<1x4x256xf32, #tpu.memory_space<vmem>>) attributes {dimension_semantics = [#tpu.dimension_semantics<parallel>, #tpu.dimension_semantics<parallel>], iteration_bounds = array<i64: 2, 1>, scalar_prefetch = 0 : i64, scratch_operands = 0 : i64, tpu.core_type = #tpu.core_type<tc>, window_params = [{transform_indices = @transform_0, window_bounds = array<i64: 1, 4, 9>}, {transform_indices = @transform_1, window_bounds = array<i64: 1, 4, 256>}, {transform_indices = @transform_2, window_bounds = array<i64: 1, 4, 256>}, {transform_indices = @transform_3, window_bounds = array<i64: 1, 4, 256>}]} {
    %c0 = arith.constant 0 : index
    %c0_0 = arith.constant 0 : index
    %c0_1 = arith.constant 0 : index
    %0 = vector.load %arg2[%c0, %c0_0, %c0_1] : memref<1x4x9xf32, #tpu.memory_space<vmem>>, vector<1x4x9xf32>
    %1 = vector.shape_cast %0 : vector<1x4x9xf32> to vector<4x9xf32>
    %cst = arith.constant dense<0xFF800000> : vector<4xf32>
    %2 = vector.multi_reduction <maximumf>, %1, %cst [1] : vector<4x9xf32> to vector<4xf32>
    %3 = vector.shape_cast %2 : vector<4xf32> to vector<4x1xf32>
    %4 = vector.broadcast %3 : vector<4x1xf32> to vector<4x9xf32>
    %5 = arith.subf %1, %4 : vector<4x9xf32>
    %6 = math.exp %5 : vector<4x9xf32>
    %cst_2 = arith.constant dense<0.000000e+00> : vector<4xf32>
    %7 = vector.multi_reduction <add>, %6, %cst_2 [1] : vector<4x9xf32> to vector<4xf32>
    %8 = vector.shape_cast %7 : vector<4xf32> to vector<4x1xf32>
    %9 = vector.broadcast %8 : vector<4x1xf32> to vector<4x9xf32>
    %10 = arith.divf %6, %9 : vector<4x9xf32>
    %c0_3 = arith.constant 0 : index
    %c0_4 = arith.constant 0 : index
    %c0_5 = arith.constant 0 : index
    %11 = vector.load %arg3[%c0_3, %c0_4, %c0_5] : memref<1x4x256xf32, #tpu.memory_space<vmem>>, vector<1x4x256xf32>
    %12 = vector.shape_cast %11 : vector<1x4x256xf32> to vector<4x256xf32>
    %13 = tpu.iota {dimensions = array<i32: 1>} : vector<4x256xi32>
    %c16_i32 = arith.constant 16 : i32
    %c0_i32 = arith.constant 0 : i32
    %14 = arith.cmpi eq, %c16_i32, %c0_i32 : i32
    %c1_i32 = arith.constant 1 : i32
    %15 = arith.select %14, %c1_i32, %c16_i32 : i32
    %16 = vector.broadcast %15 : i32 to vector<4x256xi32>
    %17 = arith.remsi %13, %16 : vector<4x256xi32>
    %c0_i32_6 = arith.constant 0 : i32
    %18 = vector.broadcast %c0_i32_6 : i32 to vector<4x256xi32>
    %19 = arith.cmpi ne, %17, %18 : vector<4x256xi32>
    %c0_i32_7 = arith.constant 0 : i32
    %20 = vector.broadcast %c0_i32_7 : i32 to vector<4x256xi32>
    %21 = arith.cmpi slt, %17, %20 : vector<4x256xi32>
    %c0_i32_8 = arith.constant 0 : i32
    %22 = arith.cmpi slt, %15, %c0_i32_8 : i32
    %23 = vector.broadcast %22 : i1 to vector<4x256xi1>
    %24 = vector.broadcast %23 : vector<4x256xi1> to vector<4x256xi1>
    %25 = arith.xori %21, %24 : vector<4x256xi1>
    %26 = arith.andi %25, %19 : vector<4x256xi1>
    %27 = vector.broadcast %15 : i32 to vector<4x256xi32>
    %28 = arith.addi %17, %27 : vector<4x256xi32>
    %29 = arith.select %26, %28, %17 : vector<4x256xi1>, vector<4x256xi32>
    %c16_i32_9 = arith.constant 16 : i32
    %30 = vector.broadcast %c16_i32_9 : i32 to vector<4x256xi32>
    %31 = arith.cmpi slt, %13, %30 : vector<4x256xi32>
    %c240_i32 = arith.constant 240 : i32
    %32 = vector.broadcast %c240_i32 : i32 to vector<4x256xi32>
    %33 = arith.cmpi sge, %13, %32 : vector<4x256xi32>
    %c0_i32_10 = arith.constant 0 : i32
    %34 = vector.broadcast %c0_i32_10 : i32 to vector<4x256xi32>
    %35 = arith.cmpi eq, %29, %34 : vector<4x256xi32>
    %c15_i32 = arith.constant 15 : i32
    %36 = vector.broadcast %c15_i32 : i32 to vector<4x256xi32>
    %37 = arith.cmpi eq, %29, %36 : vector<4x256xi32>
    %c16_i32_11 = arith.constant 16 : i32
    %38 = tpu.dynamic_rotate %12 by %c16_i32_11 dim 1 : vector<4x256xf32>, i32 -> vector<4x256xf32>
    %c240_i32_12 = arith.constant 240 : i32
    %39 = tpu.dynamic_rotate %12 by %c240_i32_12 dim 1 : vector<4x256xf32>, i32 -> vector<4x256xf32>
    %40 = arith.select %31, %39, %38 : vector<4x256xi1>, vector<4x256xf32>
    %41 = arith.select %33, %38, %39 : vector<4x256xi1>, vector<4x256xf32>
    %c1_i32_13 = arith.constant 1 : i32
    %42 = tpu.dynamic_rotate %40 by %c1_i32_13 dim 1 : vector<4x256xf32>, i32 -> vector<4x256xf32>
    %c255_i32 = arith.constant 255 : i32
    %43 = tpu.dynamic_rotate %40 by %c255_i32 dim 1 : vector<4x256xf32>, i32 -> vector<4x256xf32>
    %44 = arith.select %35, %43, %42 : vector<4x256xi1>, vector<4x256xf32>
    %45 = arith.select %37, %42, %43 : vector<4x256xi1>, vector<4x256xf32>
    %46 = vector.extract_strided_slice %10 {offsets = [0, 0], sizes = [4, 1], strides = [1, 1]} : vector<4x9xf32> to vector<4x1xf32>
    %47 = vector.broadcast %46 : vector<4x1xf32> to vector<4x256xf32>
    %48 = arith.mulf %44, %47 : vector<4x256xf32>
    %49 = vector.extract_strided_slice %10 {offsets = [0, 1], sizes = [4, 1], strides = [1, 1]} : vector<4x9xf32> to vector<4x1xf32>
    %50 = vector.broadcast %49 : vector<4x1xf32> to vector<4x256xf32>
    %51 = arith.mulf %40, %50 : vector<4x256xf32>
    %52 = arith.addf %48, %51 : vector<4x256xf32>
    %53 = vector.extract_strided_slice %10 {offsets = [0, 2], sizes = [4, 1], strides = [1, 1]} : vector<4x9xf32> to vector<4x1xf32>
    %54 = vector.broadcast %53 : vector<4x1xf32> to vector<4x256xf32>
    %55 = arith.mulf %45, %54 : vector<4x256xf32>
    %56 = arith.addf %52, %55 : vector<4x256xf32>
    %c1_i32_14 = arith.constant 1 : i32
    %57 = tpu.dynamic_rotate %12 by %c1_i32_14 dim 1 : vector<4x256xf32>, i32 -> vector<4x256xf32>
    %c255_i32_15 = arith.constant 255 : i32
    %58 = tpu.dynamic_rotate %12 by %c255_i32_15 dim 1 : vector<4x256xf32>, i32 -> vector<4x256xf32>
    %59 = arith.select %35, %58, %57 : vector<4x256xi1>, vector<4x256xf32>
    %60 = arith.select %37, %57, %58 : vector<4x256xi1>, vector<4x256xf32>
    %61 = vector.extract_strided_slice %10 {offsets = [0, 3], sizes = [4, 1], strides = [1, 1]} : vector<4x9xf32> to vector<4x1xf32>
    %62 = vector.broadcast %61 : vector<4x1xf32> to vector<4x256xf32>
    %63 = arith.mulf %59, %62 : vector<4x256xf32>
    %64 = vector.extract_strided_slice %10 {offsets = [0, 4], sizes = [4, 1], strides = [1, 1]} : vector<4x9xf32> to vector<4x1xf32>
    %65 = vector.broadcast %64 : vector<4x1xf32> to vector<4x256xf32>
    %66 = arith.mulf %12, %65 : vector<4x256xf32>
    %67 = arith.addf %63, %66 : vector<4x256xf32>
    %68 = vector.extract_strided_slice %10 {offsets = [0, 5], sizes = [4, 1], strides = [1, 1]} : vector<4x9xf32> to vector<4x1xf32>
    %69 = vector.broadcast %68 : vector<4x1xf32> to vector<4x256xf32>
    %70 = arith.mulf %60, %69 : vector<4x256xf32>
    %71 = arith.addf %67, %70 : vector<4x256xf32>
    %72 = arith.addf %56, %71 : vector<4x256xf32>
    %c1_i32_16 = arith.constant 1 : i32
    %73 = tpu.dynamic_rotate %41 by %c1_i32_16 dim 1 : vector<4x256xf32>, i32 -> vector<4x256xf32>
    %c255_i32_17 = arith.constant 255 : i32
    %74 = tpu.dynamic_rotate %41 by %c255_i32_17 dim 1 : vector<4x256xf32>, i32 -> vector<4x256xf32>
    %75 = arith.select %35, %74, %73 : vector<4x256xi1>, vector<4x256xf32>
    %76 = arith.select %37, %73, %74 : vector<4x256xi1>, vector<4x256xf32>
    %77 = vector.extract_strided_slice %10 {offsets = [0, 6], sizes = [4, 1], strides = [1, 1]} : vector<4x9xf32> to vector<4x1xf32>
    %78 = vector.broadcast %77 : vector<4x1xf32> to vector<4x256xf32>
    %79 = arith.mulf %75, %78 : vector<4x256xf32>
    %80 = vector.extract_strided_slice %10 {offsets = [0, 7], sizes = [4, 1], strides = [1, 1]} : vector<4x9xf32> to vector<4x1xf32>
    %81 = vector.broadcast %80 : vector<4x1xf32> to vector<4x256xf32>
    %82 = arith.mulf %41, %81 : vector<4x256xf32>
    %83 = arith.addf %79, %82 : vector<4x256xf32>
    %84 = vector.extract_strided_slice %10 {offsets = [0, 8], sizes = [4, 1], strides = [1, 1]} : vector<4x9xf32> to vector<4x1xf32>
    %85 = vector.broadcast %84 : vector<4x1xf32> to vector<4x256xf32>
    %86 = arith.mulf %76, %85 : vector<4x256xf32>
    %87 = arith.addf %83, %86 : vector<4x256xf32>
    %88 = arith.addf %72, %87 : vector<4x256xf32>
    %c0_18 = arith.constant 0 : index
    %c0_19 = arith.constant 0 : index
    %c0_20 = arith.constant 0 : index
    %89 = vector.load %arg4[%c0_18, %c0_19, %c0_20] : memref<1x4x256xf32, #tpu.memory_space<vmem>>, vector<1x4x256xf32>
    %90 = vector.shape_cast %89 : vector<1x4x256xf32> to vector<4x256xf32>
    %91 = vector.shape_cast %88 : vector<4x256xf32> to vector<1x4x256xf32>
    tpu.vector_store %arg4[%c0_18, %c0_19, %c0_20], %91 {strides = array<i32>} : memref<1x4x256xf32, #tpu.memory_space<vmem>>, vector<1x4x256xf32>,
    %92 = arith.subf %12, %88 : vector<4x256xf32>
    %c0_21 = arith.constant 0 : index
    %c0_22 = arith.constant 0 : index
    %c0_23 = arith.constant 0 : index
    %93 = vector.load %arg5[%c0_21, %c0_22, %c0_23] : memref<1x4x256xf32, #tpu.memory_space<vmem>>, vector<1x4x256xf32>
    %94 = vector.shape_cast %93 : vector<1x4x256xf32> to vector<4x256xf32>
    %95 = vector.shape_cast %92 : vector<4x256xf32> to vector<1x4x256xf32>
    tpu.vector_store %arg5[%c0_21, %c0_22, %c0_23], %95 {strides = array<i32>} : memref<1x4x256xf32, #tpu.memory_space<vmem>>, vector<1x4x256xf32>,
    return
  }
  func.func @transform_0(%arg0: i32, %arg1: i32) -> (i32, i32, i32) {
    %c0_i32 = arith.constant 0 : i32
    %c0_i32_0 = arith.constant 0 : i32
    return %arg0, %arg1, %c0_i32 : i32, i32, i32
  }
  func.func @transform_1(%arg0: i32, %arg1: i32) -> (i32, i32, i32) {
    %c0_i32 = arith.constant 0 : i32
    %c0_i32_0 = arith.constant 0 : i32
    return %arg0, %arg1, %c0_i32 : i32, i32, i32
  }
  func.func @transform_2(%arg0: i32, %arg1: i32) -> (i32, i32, i32) {
    %c0_i32 = arith.constant 0 : i32
    %c0_i32_0 = arith.constant 0 : i32
    return %arg0, %arg1, %c0_i32 : i32, i32, i32
  }
  func.func @transform_3(%arg0: i32, %arg1: i32) -> (i32, i32, i32) {
    %c0_i32 = arith.constant 0 : i32
    %c0_i32_0 = arith.constant 0 : i32
    return %arg0, %arg1, %c0_i32 : i32, i32, i32
  }
}

</mosaic_0001>

<bundles_post_ra>
// kernel: tpu_custom_call.1
= control target key start
LH: loop header
LB: loop body
LE: loop exit
PB: predicated region body
PF: predicated region fallthrough
CT: control target
= control target key end

     0   :  { %9 = vsyncpa [#allocation3], 0  ;;  %s1302_s0 = inlined_call_operand.hbm [shape: f32[2,4,9], index: 0, kind: input, shape index: {}]   ;;  %s1303_s1 = inlined_call_operand.hbm [shape: f32[2,4,256], index: 1, kind: input, shape index: {}]   ;;  %s1304_s2 = inlined_call_operand.hbm [shape: f32[2,4,256], index: 2, kind: output, shape index: {0}]   ;;  %s1305_s3 = inlined_call_operand.hbm [shape: f32[2,4,256], index: 3, kind: output, shape index: {1}]  }
   0x1   :  { %11 = vsyncpa [#allocation3 + $0x1], 0 }
   0x2   :  { %12 = vsyncpa [#allocation6], 0 }
   0x3   :  { %14 = vsyncpa [#allocation6 + $0x1], 0 }
   0x4   :  { %15 = vsyncpa [#allocation4], 0 }
   0x5   :  { %17 = vsyncpa [#allocation4 + $0x1], 0 }
   0x6   :  { %18 = vsyncpa [#allocation9], 0 }
   0x7   :  { %20 = vsyncpa [#allocation9 + $0x1], 0  ;;  %s1025_s12 = smov 0   ;;  %s1027_s13 = smov 0  }
   0x8   :  { %s1029_s14 = smov 0   ;;  %s1031_s15 = smov 0  }
   0x9   :  { %s1033_s16 = smov 0   ;;  %s1035_s17 = smov 0  }
   0xa LB: > { %s686_s18 = sadd.s32 4294967295, %s989_s17   ;;  %s687_s19 = sadd.s32 4294967294, %s989_s17   ;;  %s989_s17 = sphi %s1035_s17, %s26_s17   ;;  %s985_s16 = sphi %s1033_s16, %s1323_s16   ;;  %s981_s15 = sphi %s1031_s15, %s1322_s15   ;;  %s977_s14 = sphi %s1029_s14, %s1321_s14   ;;  %s973_s13 = sphi %s1027_s13, %s1320_s13   ;;  %s969_s12 = sphi %s1025_s12, %s1319_s12  }
   0xb   : > { %s38_s20 = sadd.s32 1, %s985_s16  ;;  %s47_s21 = sadd.s32 1, %s977_s14 }
   0xc   : > { %p40_p0 = scmp.ge.s32.totalorder %s38_s20, 2  ;;  %p54_p1 = scmp.ne.s32.totalorder %s977_s14, %s973_s13 }
   0xd   : > { %p55_p2 = scmp.eq.s32.totalorder %s989_s17, 0  ;;  %p60_p3 = scmp.ne.s32.totalorder %s973_s13, %s969_s12 }
   0xe   : > { %s1325_s20 = smov (%p40_p0, %s38_s20), 0  ;;  %p61_p5 = scmp.eq.s32.totalorder %s686_s18, 0 }
   0xf   : > { %p1066_p4 = por %p55_p2, %p54_p1  ;;  %s42_s23 = ssub.s32 %s985_s16, %s1325_s20 }
  0x10   : > { %p114_p6 = scmp.eq.s32.totalorder %s686_s18, 1  ;;  %p45_p7 = scmp.eq.s32.totalorder %s42_s23, 0 }
  0x11   : > { %p1072_p8 = por %p61_p5, %p60_p3  ;;  %p120_p10 = scmp.eq.s32.totalorder %s687_s19, 1 }
  0x12   : > { %p1076_p9 = por %p114_p6, %p54_p1  ;;  %p689_p12 = scmp.ge.s32.totalorder %s989_s17, 2 }
  0x13   : > { %s1081_s26 = scalar_select %p45_p7, %s977_s14, %s47_s21  }
  0x14   : > { %p1083_p11 = por %p120_p10, %p60_p3  ;;  %p733_p13 = scmp.lt.s32.totalorder %s989_s17, 2 }
  0x15   : > { %s168_s28 = sand.u32 1, %s977_s14   ;;  %s691_s30 = sshll.u32 %s985_s16, 2 }
  0x16   : > { %s690_s29 = sshll.u32 %s168_s28, 2  ;;  %s177_s6 = scalar_lea.hbm %s1302_s0, %s691_s30 }
  0x17   : > { %s172_s7 = scalar_lea.vmem [#allocation2], %s690_s29  ;;  %s179_s9 = sshll.u32 %s177_s6, 4  ;;  %s180_s9 = int_to_ptr.hbm [resolvable:$true] %s179_s9 }
  0x18   : > { %s181_s8 = sshll.u32 %s172_s7, 4  ;;  %p1096_p0 = pnand %p733_p13, %p1066_p4  ;;  %s182_s8 = int_to_ptr.vmem [resolvable:$true] %s181_s8 }
  0x19   : > { %p695_p1 = scmp.ge.s32.totalorder %s989_s17, 1  ;;  %p208_p2 = scmp.lt.s32.totalorder %s989_s17, 3 }
  0x1a   : > { %s169_s11 = scalar_lea.sflag [#allocation3], %s168_s28  ;;  %s692_s18 = sshll.u32 %s168_s28, 3 }
  0x1b   : > { %722 = dma.hbm_to_vmem [thread:$0]  (!%p1096_p0), %s180_s9, 64, %s182_s8, %s169_s11  }
  0x1c   : > { %p209_p3 = pnand %p695_p1, %p208_p2  ;;  %s708_s19 = sshll.u32 %s985_s16, 3 }
  0x1d   : > { %s199_s29 = scalar_lea.hbm %s1303_s1, %s708_s19  ;;  %s192_s30 = scalar_lea.vmem [#allocation5], %s692_s18 }
  0x1e   : > { %s203_s22 = sshll.u32 %s192_s30, 4  ;;  %s201_s4 = sshll.u32 %s199_s29, 4  ;;  %s204_s22 = int_to_ptr.vmem [resolvable:$true] %s203_s22  ;;  %s202_s4 = int_to_ptr.hbm [resolvable:$true] %s201_s4 }
  0x1f   : > { %s189_s5 = scalar_lea.sflag [#allocation6], %s168_s28  ;;  %212 = sbr.rel (%p209_p3) target bundleno = 465 (0x1d1), region = 28 }
  0x20   : > { %725 = dma.hbm_to_vmem [thread:$0]  (!%p1096_p0), %s202_s4, 128, %s204_s22, %s189_s5  }
  0x21   : > { %s1111_s6 = sand.u32 (!%p209_p3), 1, %s973_s13  }
  0x22   : > { %s696_s7 = sshll.u32 (!%p209_p3), %s1111_s6, 2  ;;  %s215_s8 = scalar_lea.sflag (!%p209_p3), [#allocation3], %s1111_s6 }
  0x23   : > { %s218_s9 = scalar_lea.vmem (!%p209_p3), [#allocation2], %s696_s7 }
  0x24   : > { %952 = dma.done.wait (%p1072_p8), %s215_s8, 64  }
  0x25   : > { %954 = vsyncadd (%p1072_p8), %s215_s8, 4294967232  ;;  %s1120_s28 = sshll.u32 %s1111_s6, 3  ;;  %s225_s10 = scalar_lea.sflag [#allocation6], %s1111_s6 }
  0x26   : > { %s228_s11 = scalar_lea.vmem [#allocation5], %s1120_s28 }
  0x27   : > { %956 = dma.done.wait (%p1072_p8), %s225_s10, 128  }
  0x28   : > { %958 = vsyncadd (%p1072_p8), %s225_s10, 4294967168  ;;  %vm263_vm0 = vcmask 68608   ;;  %v262_v0 = vld [vmem:[%s218_s9] sm:$0xf]  ;;  %v1128_v1 = vld [vmem:[%s228_s11] sm:$0xff]  ;;  %s991_s18 = smov 16   ;;  %v289_v15 = vlaneseq }
  0x29   : > { %v264_v2 = vsel %vm263_vm0, %v262_v0, -inf  ;;  %325 = vst [vmem:[#allocation1] ss:$2 sm:$0xff] %v1128_v1  ;;  %s992_s24 = smov 112   ;;  %s993_s19 = smov 1   ;;  %v995_v29 = vmov 4  }
  0x2a   : > { %265 = vmax.xlane.f32.xlu0 %v264_v2  ;;  %s994_s21 = smov 127   ;;  %v1139_v17 = vand.u32 127, %v289_v15  ;;  %v996_v30 = vmov 1   ;;  %v997_v31 = vmov 0   ;;  %v998_v44 = vmov 3   ;;  %s709_s23 = sshll.u32 %s981_s15, 3 }
  0x2b   : > { %800 = vset.pattern.permute.xlu0 %v995_v29  ;;  %798 = vset.pattern.permute.xlu1 %v996_v30  ;;  %v999_v45 = vmov 6   ;;  %v1000_v46 = vmov 2   ;;  %v1001_v47 = vmov 5   ;;  %v1002_v48 = vmov 8   ;;  %s520_s22 = scalar_lea.hbm %s1304_s2, %s709_s23  ;;  %s537_s5 = scalar_lea.hbm %s1305_s3, %s709_s23 }
  0x2c   : > { %vm316_vm1 = vcmp.lt.s32.totalorder %v1139_v17, 16  ;;  %vm345_vm2 = vcmp.lt.s32.totalorder %v1139_v17, 112  ;;  %v1149_v25 = vadd.s32 128, %v1139_v17  ;;  %797 = vset.pattern.permute.xlu2 %v997_v31  ;;  %v1003_v49 = vmov 7   ;;  %s254_s7 = scalar_lea.vmem [#allocation7], %s1120_s28  ;;  %s524_s9 = sshll.u32 %s520_s22, 4  ;;  %s525_s9 = int_to_ptr.hbm [resolvable:$true] %s524_s9 }
  0x2d   : > { %v1004_v62 = vmov 839922192   ;;  %vm356_vm8 = vcmp.lt.s32.totalorder %v1139_v17, 1  ;;  %vm363_vm9 = vcmp.lt.s32.totalorder %v1139_v17, 127  ;;  %s1243_s8 = sshll.u32 %s254_s7, 4  ;;  %vm495_vm14 = vcmask 1043456   ;;  %s523_s8 = int_to_ptr.vmem [resolvable:$true] %s1243_s8 }
  0x2e   : > { %vm319_vm3 = vcmp.ge.s32.totalorder %v1149_v25, 240  ;;  %v429_v63 = vunpack.c.l.s4 %v1004_v62  ;;  %s261_s10 = scalar_lea.vmem [#allocation8], %s1120_s28  ;;  %s891_s29 = scalar_lea.hbm %s1304_s2, 16 }
  0x2f   : > { %s1246_s11 = sshll.u32 %s261_s10, 4  ;;  %s540_s11 = int_to_ptr.vmem [resolvable:$true] %s1246_s11 }
  0x30   : > { %v326_v3 = vld.sshfl [vmem:[#allocation1] sm:$0xff pattern:$0x75316420]  ;;  %v327_v4 = vld.sshfl [vmem:[#allocation1 + $0x8] sm:$0xff pattern:$0x75316420]  ;;  %v430_v2 = vunpack.c.0.s8 %v429_v63 }
  0x31   : > { %330 = vrot.lane.b32.xlu1 %v326_v3, %s991_s18  ;;  %336 = vst [vmem:[#allocation1] ss:$2 sm:$0xff] %v1128_v1 }
  0x38   : > { %v337_v5 = vld.sshfl [vmem:[#allocation1] sm:$0xff pattern:$0x75316420]  ;;  %v338_v6 = vld.sshfl [vmem:[#allocation1 + $0x8] sm:$0xff pattern:$0x75316420] }
  0x39   : > { %332 = vrot.lane.b32.xlu1 %v327_v4, %s991_s18  ;;  %341 = vrot.lane.b32.xlu2 %v337_v5, %s992_s24  ;;  %393 = vst [vmem:[#allocation1] ss:$2 sm:$0xff] %v1128_v1  ;;  %s541_s18 = sshll.u32 %s537_s5, 4  ;;  %s1251_s18 = int_to_ptr.hbm [resolvable:$true] %s541_s18 }
  0x40   : > { %v394_v7 = vld.sshfl [vmem:[#allocation1] sm:$0xff pattern:$0x75316420]  ;;  %v395_v8 = vld.sshfl [vmem:[#allocation1 + $0x8] sm:$0xff pattern:$0x75316420] }
  0x41   : > { %343 = vrot.lane.b32.xlu2 %v338_v6, %s992_s24  ;;  %398 = vrot.lane.b32.xlu1 %v394_v7, %s993_s19  ;;  %404 = vst [vmem:[#allocation1] ss:$2 sm:$0xff] %v1128_v1  ;;  %v296_v7 = vand.u32 15, %v1139_v17  ;;  %s502_s24 = scalar_lea.sflag [#allocation4], %s1111_s6 }
  0x43   : > { %vm1181_vm10 = vcmp.eq.s32.totalorder %v296_v7, 0  ;;  %vm1197_vm12 = vcmp.eq.s32.totalorder %v296_v7, 15 }
  0x48   : > { %v405_v9 = vld.sshfl [vmem:[#allocation1] sm:$0xff pattern:$0x75316420]  ;;  %v406_v11 = vld.sshfl [vmem:[#allocation1 + $0x8] sm:$0xff pattern:$0x75316420] }
  0x49   : > { %400 = vrot.lane.b32.xlu2 %v395_v8, %s993_s19  ;;  %409 = vrot.lane.b32.xlu1 %v405_v9, %s994_s21  ;;  %v303_v8 = vand.u32 15, %v1149_v25 }
  0x4b   : > { %vm1185_vm11 = vcmp.eq.s32.totalorder %v303_v8, 0  ;;  %vm1201_vm13 = vcmp.eq.s32.totalorder %v303_v8, 15 }
  0x51   : > { %411 = vrot.lane.b32.xlu2 %v406_v11, %s994_s21 }
  0x93   : > { %v342_v13 = vpop.permute.xlu2 %341 }
  0x9b   : > { %v344_v20 = vpop.permute.xlu2 %343 }
  0x9c   : > { %v1146_v24 = vsel %vm345_vm2, %v342_v13, %v344_v20  ;;  %v347_v27 = vsel %vm345_vm2, %v344_v20, %v342_v13 }
  0x9d   : > { %v266_v10 = vpop.xlane.xlu0 %265 }
  0x9e   : > { %v267_v12 = vsub.f32 %v262_v0, %v266_v10 }
  0xa0   : > { %v268_v14 = vmul.f32 1.442695, %v267_v12 }
  0xa2   : > { %807 = vpow2.f32 %v268_v14 }
  0xa3   : > { %v331_v16 = vpop.permute.xlu1 %330  ;;  %v401_v51 = vpop.permute.xlu2 %400 }
  0xa8   : > { %v808_v18 = vpop.eup %807 }
  0xa9   : > { %v270_v19 = vsel %vm263_vm0, %v808_v18, 0.0 }
  0xaa   : > { %271 = vadd.xlane.f32.xlu0 %v270_v19 }
  0xab   : > { %v333_v21 = vpop.permute.xlu1 %332  ;;  %v412_v53 = vpop.permute.xlu2 %411 }
  0xac   : > { %v1144_v22 = vsel %vm316_vm1, %v331_v16, %v333_v21  ;;  %v335_v23 = vsel %vm316_vm1, %v333_v21, %v331_v16 }
  0xad   : > { %354 = vrot.lane.b32.xlu1 %v1144_v22, %s993_s19  ;;  %v1154_v26 = vsel %vm316_vm1, %v1146_v24, %v335_v23  ;;  %v1160_v28 = vsel %vm319_vm3, %v1144_v22, %v347_v27 }
  0xae   : > { %359 = vrot.lane.b32.xlu2 %v1154_v26, %s994_s21 }
  0xb3   : > { %v399_v50 = vpop.permute.xlu1 %398 }
  0xb4   : > { %v402_v10 = vsel %vm356_vm8, %v399_v50, %v401_v51  ;;  %v403_v12 = vsel %vm356_vm8, %v401_v51, %v399_v50 }
  0xb5   : > { %361 = vrot.lane.b32.xlu1 %v1144_v22, %s994_s21 }
  0xb6   : > { %454 = vrot.lane.b32.xlu2 %v1160_v28, %s993_s19 }
  0xbb   : > { %v410_v52 = vpop.permute.xlu1 %409 }
  0xbc   : > { %v413_v13 = vsel %vm363_vm9, %v410_v52, %v412_v53  ;;  %v414_v23 = vsel %vm363_vm9, %v412_v53, %v410_v52 }
  0xbd   : > { %452 = vrot.lane.b32.xlu1 %v1146_v24, %s993_s19  ;;  %v417_v52 = vsel %vm1197_vm12, %v403_v12, %v413_v13  ;;  %v418_v53 = vsel %vm1201_vm13, %v402_v10, %v414_v23 }
  0xbe   : > { %352 = vrot.lane.b32.xlu0 %v1154_v26, %s993_s19  ;;  %460 = vrot.lane.b32.xlu2 %v1160_v28, %s994_s21  ;;  %s885_s19 = sshra.s32 %s525_s9, 4  ;;  %s886_s19 = int_to_ptr.hbm [resolvable:$true] %s885_s19 }
  0xbf   : > { %p892_p7 = scmp.lt.s32.totalorder %s886_s19, %s1304_s2 }
  0xc5   : > { %458 = vrot.lane.b32.xlu1 %v1146_v24, %s994_s21  ;;  %s887_s21 = scalar_lea.hbm %s886_s19, 8 }
  0xc6   : > { %p888_p4 = scmp.ne.s32.totalorder %s886_s19, %s887_s21  ;;  %p893_p8 = scmp.lt.s32.totalorder %s891_s29, %s887_s21 }
  0xc8   : > { %p889_p5 = pnand %p888_p4, %p1076_p9  ;;  %p894_p10 = por %p893_p8, %p892_p7 }
  0xca   : > { %p890_p6 = pneg %p889_p5 }
  0xcc   : > { %p895_p13 = pnand %p894_p10, %p890_p6 }
 0x108   : > { %v360_v55 = vpop.permute.xlu2 %359 }
 0x110   : > { %v455_v57 = vpop.permute.xlu2 %454 }
 0x118   : > { %v461_v59 = vpop.permute.xlu2 %460 }
 0x11d   : > { %v272_v32 = vpop.xlane.xlu0 %271 }
 0x11e   : > { %809 = vrcp.f32 %v272_v32  ;;  %v284_v36 = vand.u32 2147483648, %v272_v32  ;;  %v282_v38 = vand.u32 2147483647, %v272_v32  ;;  %vm278_vm5 = vweird.f32 %v272_v32 }
 0x11f   : > { %v355_v54 = vpop.permute.xlu1 %354 }
 0x120   : > { %v285_v40 = vor.u32 1.1754944e-38, %v284_v36  ;;  %vm283_vm7 = vcmp.eq.f32.partialorder %v282_v38, 8.507059e+37 }
 0x124   : > { %v810_v33 = vpop.eup %809 }
 0x125   : > { %v274_v34 = vmul.f32 %v810_v33, %v272_v32  ;;  %vm279_vm4 = vweird.f32 %v810_v33 }
 0x126   : > { %vm280_vm6 = vmor %vm278_vm5, %vm279_vm4 }
 0x127   : > { %v275_v35 = vsub.f32 1.0, %v274_v34  ;;  %v362_v56 = vpop.permute.xlu1 %361 }
 0x128   : > { %v365_v19 = vsel %vm363_vm9, %v362_v56, %v360_v55 }
 0x129   : > { %v276_v37 = vmul.f32 %v810_v33, %v275_v35 }
 0x12b   : > { %v277_v39 = vadd.f32 %v810_v33, %v276_v37  ;;  %v415_v37 = vsel %vm1181_vm10, %v413_v13, %v403_v12 }
 0x12d   : > { %v281_v41 = vsel %vm280_vm6, %v810_v33, %v277_v39 }
 0x12e   : > { %v286_v42 = vsel %vm283_vm7, %v285_v40, %v281_v41  ;;  %v416_v40 = vsel %vm1185_vm11, %v414_v23, %v402_v10 }
 0x12f   : > { %v287_v43 = vmul.f32 %v808_v18, %v286_v42  ;;  %v453_v58 = vpop.permute.xlu1 %452  ;;  %v364_v18 = vsel %vm363_vm9, %v360_v55, %v362_v56 }
 0x130   : > { %v353_v61 = vpop.permute.xlu0 %352  ;;  %v456_v25 = vsel %vm356_vm8, %v453_v58, %v455_v57  ;;  %v457_v27 = vsel %vm356_vm8, %v455_v57, %v453_v58 }
 0x131   : > { %426 = vperm.xlu0 %800, %v287_v43   ;;  %378 = vperm.xlu1 %798, %v287_v43   ;;  %v357_v20 = vsel %vm356_vm8, %v353_v61, %v355_v54  ;;  %v358_v21 = vsel %vm356_vm8, %v355_v54, %v353_v61 }
 0x132   : > { %372 = vperm.xlu2 %797, %v287_v43   ;;  %v366_v35 = vsel %vm1181_vm10, %v364_v18, %v358_v21  ;;  %v367_v36 = vsel %vm1185_vm11, %v365_v19, %v357_v20  ;;  %v369_v17 = vsel %vm1201_vm13, %v357_v20, %v365_v19 }
 0x137   : > { %v459_v60 = vpop.permute.xlu1 %458 }
 0x138   : > { %v462_v29 = vsel %vm363_vm9, %v459_v60, %v461_v59  ;;  %v463_v34 = vsel %vm363_vm9, %v461_v59, %v459_v60 }
 0x139   : > { %801 = vset.pattern.permute.xlu0 %v998_v44  ;;  %803 = vset.pattern.permute.xlu1 %v999_v45  ;;  %v464_v42 = vsel %vm1181_vm10, %v462_v29, %v457_v27 }
 0x13a   : > { %799 = vset.pattern.permute.xlu2 %v1000_v46  ;;  %420 = vperm.xlu0 %801, %v287_v43  }
 0x13b   : > { %469 = vperm.xlu1 %803, %v287_v43   ;;  %386 = vperm.xlu2 %799, %v287_v43  }
 0x142   : > { %802 = vset.pattern.permute.xlu0 %v1001_v47  ;;  %v465_v47 = vsel %vm1185_vm11, %v463_v34, %v456_v25 }
 0x143   : > { %805 = vset.pattern.permute.xlu1 %v1002_v48  ;;  %804 = vset.pattern.permute.xlu2 %v1003_v49  ;;  %v467_v49 = vsel %vm1201_vm13, %v456_v25, %v463_v34 }
 0x144   : > { %443 = vperm.xlu0 %802, %v287_v43   ;;  %483 = vperm.xlu1 %805, %v287_v43  }
 0x145   : > { %475 = vperm.xlu2 %804, %v287_v43  }
 0x14c   : > { %806 = vset.pattern.permute.xlu0 %v1002_v48 }
 0x18c   : > { %v373_v0 = vpop.permute.xlu2 %372 }
 0x18d   : > { %v375_v38 = vmul.f32 %v373_v0, %v366_v35  ;;  %v376_v39 = vmul.f32 %v373_v0, %v367_v36 }
 0x195   : > { %v387_v9 = vpop.permute.xlu2 %386 }
 0x196   : > { %v390_v54 = vmul.f32 %v387_v9, %v369_v17 }
 0x19f   : > { %v476_v41 = vpop.permute.xlu2 %475 }
 0x1a0   : > { %v479_v55 = vmul.f32 %v476_v41, %v1160_v28  ;;  %v478_v0 = vmul.f32 %v476_v41, %v1146_v24 }
 0x1a3   : > { %v379_v3 = vpop.permute.xlu1 %378  ;;  %v427_v4 = vpop.permute.xlu0 %426 }
 0x1a4   : > { %v431_v5 = vperm.slane %v427_v4, %v430_v2  ;;  %v381_v32 = vmul.f32 %v379_v3, %v1154_v26  ;;  %v382_v33 = vmul.f32 %v379_v3, %v1144_v22  ;;  %v368_v22 = vsel %vm1197_vm12, %v358_v21, %v364_v18 }
 0x1a5   : > { %v389_v50 = vmul.f32 %v387_v9, %v368_v22  ;;  %v466_v4 = vsel %vm1197_vm12, %v457_v27, %v462_v29 }
 0x1a6   : > { %v433_v6 = vmul.f32 %v431_v5, %v1128_v1  ;;  %v383_v45 = vadd.f32 %v381_v32, %v375_v38  ;;  %v384_v46 = vadd.f32 %v382_v33, %v376_v39 }
 0x1a8   : > { %435 = vst [vmem:[#allocation1] ss:$2 sm:$0xff] %v433_v6  ;;  %v391_v2 = vadd.f32 %v389_v50, %v383_v45  ;;  %v392_v3 = vadd.f32 %v390_v54, %v384_v46 }
 0x1ac   : > { %v421_v11 = vpop.permute.xlu0 %420 }
 0x1ad   : > { %v470_v16 = vpop.permute.xlu1 %469  ;;  %v423_v26 = vmul.f32 %v421_v11, %v415_v37  ;;  %v424_v44 = vmul.f32 %v421_v11, %v416_v40 }
 0x1ae   : > { %v473_v51 = vmul.f32 %v470_v16, %v465_v47  ;;  %v472_v56 = vmul.f32 %v470_v16, %v464_v42 }
 0x1af   : > { %v436_v43 = vld.sshfl [vmem:[#allocation1] sm:$0xff pattern:$0x75316420]  ;;  %v437_v48 = vld.sshfl [vmem:[#allocation1 + $0x8] sm:$0xff pattern:$0x75316420] }
 0x1b0   : > { %v440_v57 = vadd.f32 %v436_v43, %v423_v26  ;;  %v441_v60 = vadd.f32 %v437_v48, %v424_v44  ;;  %v481_v5 = vadd.f32 %v479_v55, %v473_v51  ;;  %v480_v8 = vadd.f32 %v478_v0, %v472_v56 }
 0x1b6   : > { %v484_v58 = vpop.permute.xlu1 %483  ;;  %v444_v59 = vpop.permute.xlu0 %443 }
 0x1b7   : > { %v487_v61 = vmul.f32 %v484_v58, %v467_v49  ;;  %v446_v62 = vmul.f32 %v444_v59, %v417_v52  ;;  %v447_v63 = vmul.f32 %v444_v59, %v418_v53  ;;  %v486_v6 = vmul.f32 %v484_v58, %v466_v4 }
 0x1b9   : > { %v448_v28 = vadd.f32 %v446_v62, %v440_v57  ;;  %v449_v7 = vadd.f32 %v447_v63, %v441_v60  ;;  %v489_v9 = vadd.f32 %v487_v61, %v481_v5  ;;  %v488_v24 = vadd.f32 %v486_v6, %v480_v8 }
 0x1bb   : > { %v450_v10 = vadd.f32 %v448_v28, %v391_v2  ;;  %v451_v11 = vadd.f32 %v449_v7, %v392_v3 }
 0x1bd   : > { %v491_v12 = vadd.f32 %v489_v9, %v451_v11  ;;  %v490_v13 = vadd.f32 %v488_v24, %v450_v10 }
 0x1bf   : > { %v494_v14 = vrot.slane %v491_v12, 4 }
 0x1c1   : > { %v496_v15 = vsel %vm495_vm14, %v490_v13, %v494_v14 }
 0x1c2   : > { %498 = vst [vmem:[%s254_s7] sm:$0xff] %v496_v15  ;;  %v499_v16 = vsub.f32 %v1128_v1, %v496_v15 }
 0x1c3   : > { %898 = shalt.err (!%p895_p13)
}
 0x1c4   : > { %715 = dma.vmem_to_hbm [thread:$0]  (%p1076_p9), %s523_s8, 128, %s525_s9, %s502_s24   ;;  %500 = vst [vmem:[%s261_s10] sm:$0xff] %v499_v16 }
 0x1c5   : > { %s507_s15 = scalar_lea.sflag [#allocation9], %s1111_s6  ;;  %s913_s4 = sshra.s32 %s1251_s18, 4  ;;  %s914_s4 = int_to_ptr.hbm [resolvable:$true] %s913_s4 }
 0x1c6   : > { %s915_s5 = scalar_lea.hbm %s914_s4, 8  ;;  %s919_s21 = scalar_lea.hbm %s1305_s3, 16 }
 0x1c7   : > { %p916_p0 = scmp.ne.s32.totalorder %s914_s4, %s915_s5  ;;  %p920_p3 = scmp.lt.s32.totalorder %s914_s4, %s1305_s3 }
 0x1c8   : > { %p921_p4 = scmp.lt.s32.totalorder %s919_s21, %s915_s5 }
 0x1c9   : > { %p917_p1 = pnand %p916_p0, %p1076_p9 }
 0x1ca   : > { %p922_p5 = por %p921_p4, %p920_p3 }
 0x1cb   : > { %p918_p2 = pneg %p917_p1 }
 0x1cd   : > { %p923_p6 = pnand %p922_p5, %p918_p2 }
 0x1cf   : > { %926 = shalt.err (!%p923_p6)
}
 0x1d0   : > { %716 = dma.vmem_to_hbm [thread:$0]  (%p1076_p9), %s540_s11, 128, %s1251_s18, %s507_s15  }
 0x1d1 PF: > { %s553_s6 = sand.u32 1, %s969_s12   ;;  %p727_p7 = pnand %p689_p12, %p1083_p11 }
 0x1d2   : > { %s554_s8 = scalar_lea.sflag [#allocation4], %s553_s6 }
 0x1d3   : > { %p728_p8 = pneg %p727_p7 }
 0x1d5   : > { %960 = dma.done.wait (%p728_p8), %s554_s8, 128  }
 0x1d6   : > { %962 = vsyncadd (%p728_p8), %s554_s8, 4294967168  ;;  %s564_s9 = scalar_lea.sflag [#allocation9], %s553_s6 }
 0x1d7   : > { %964 = dma.done.wait (%p728_p8), %s564_s9, 128  }
 0x1d8   : > { %966 = vsyncadd (%p728_p8), %s564_s9, 4294967168  ;;  %s26_s17 = sadd.s32 1, %s989_s17   ;;  %s1319_s12 = smov %s973_s13 }
 0x1d9   : > { %p23_p10 = scmp.ge.s32.totalorder %s26_s17, 4   ;;  %s1320_s13 = smov %s977_s14 }
 0x1da   : > { %s1321_s14 = smov %s1081_s26  ;;  %s1322_s15 = smov %s985_s16 }
 0x1db   : > { %s1323_s16 = smov %s1325_s20  ;;  %25 = sbr.rel (!%p23_p10) target bundleno = 10 (0xa), region = 103 }
 0x1e0   :  { %570 = vsyncpa [#allocation3], 1 }
 0x1e1   :  { %572 = vsyncpa [#allocation3 + $0x1], 1 }
 0x1e2   :  { %573 = vsyncpa [#allocation6], 1 }
 0x1e3   :  { %575 = vsyncpa [#allocation6 + $0x1], 1 }
 0x1e4   :  { %576 = vsyncpa [#allocation4], 1 }
 0x1e5   :  { %578 = vsyncpa [#allocation4 + $0x1], 1 }
 0x1e6   :  { %579 = vsyncpa [#allocation9], 1 }
 0x1e7   :  { %581 = vsyncpa [#allocation9 + $0x1], 1 }

</bundles_post_ra>
